<compile_context>
chip_gen: v6e
topology: v6e:2x2x1
jax: 0.10.0
libtpu: 0.0.40
codegen_flags: <defaults>
</compile_context>

<pallas_src>
import functools

import jax
import jax.numpy as jnp
from jax.experimental import pallas as pl
from jax.experimental.pallas import tpu as pltpu

OUT_FEATURES = 4
LANE = 128
# Use a lane-dense (128-wide, zero-padded) output store only when the input is
# wide enough that the extra output write traffic is negligible vs. reading x.
LANE_DENSE_MIN_F = 512

# Odd 32-bit mixing constants (murmur3-style finalizer), as signed int32.
_M1 = 0x9E3779B1 - (1 << 32)
_M2 = 0x85EBCA6B - (1 << 32)
_M3 = 0xC2B2AE35 - (1 << 32)


def _round_up(x: int, m: int) -> int:
    return ((x + m - 1) // m) * m


def _lshr(h, s: int):
    """Logical right shift of an int32 array by a static amount (jnp-only)."""
    return (h >> s) & ((1 << (32 - s)) - 1)


def dropout_fc_kernel(seed_ref, x_ref, w_ref, b_ref, o_ref, *,
                      p: float, bf16_matmul: bool):
    """Fused (inverted) dropout + fully-connected layer for one batch tile.

    seed_ref : SMEM int32[1]       - PRNG seed (scalar prefetch; used iff p>0)
    x_ref    : VMEM [TM, F]        - input activation tile
    w_ref    : VMEM [F, NC]        - weight (NC = 4, or 128 when lane-padded)
    b_ref    : VMEM [1, NC]        - bias (f32)
    o_ref    : VMEM [TM, NC]       - output tile
    """
    x = x_ref[...]

    if 0.0 < p < 1.0:   # static Python branch: only traced when dropout active
        tm, f = x.shape
        # Stateless hash of (global element index, seed): grid-invariant mask,
        # no TPU-only PRNG primitives needed.  int32 overflow wraps (XLA).
        row = jax.lax.broadcasted_iota(jnp.int32, (tm, f), 0) + pl.program_id(0) * tm
        col = jax.lax.broadcasted_iota(jnp.int32, (tm, f), 1)
        h = (row * jnp.int32(f) + col) * jnp.int32(_M1) + seed_ref[0]
        h = (h ^ _lshr(h, 16)) * jnp.int32(_M2)
        h = (h ^ _lshr(h, 13)) * jnp.int32(_M3)
        h = h ^ _lshr(h, 16)
        u31 = h & 0x7FFFFFFF                               # uniform in [0, 2^31)
        thresh = min(int(p * float(1 << 31)), (1 << 31) - 1)
        keep = u31 >= jnp.int32(thresh)                    # P(drop) == p
        x = jnp.where(keep, x, jnp.zeros_like(x))

    w = w_ref[...]
    if bf16_matmul:                     # MXU-native path (optional, off by default)
        x = x.astype(jnp.bfloat16)
        w = w.astype(jnp.bfloat16)

    acc = jnp.dot(x, w, preferred_element_type=jnp.float32)
    acc = acc + b_ref[...].astype(jnp.float32)
    if 0.0 < p < 1.0:
        # 1/(1-p) rescale on the small [TM, NC] output, not the [TM, F] input.
        acc = acc * jnp.float32(1.0 / (1.0 - p))
    o_ref[...] = acc.astype(o_ref.dtype)


def _vmem_limit_bytes() -> int:
    """Explicit scoped-VMEM limit: ~75% of physical VMEM (96 MiB on v5e/v6e,
    48 MiB on v7x); conservative 48 MiB if the query is unavailable."""
    try:
        cap = int(pltpu.get_tpu_info().vmem_capacity_bytes)
    except Exception:
        cap = 64 << 20
    return max(32 << 20, min((cap * 3) // 4, 96 << 20))


def _pick_tile_rows(B, F, x_itemsize, out_cols, out_itemsize, p,
                    vmem_limit, w_bytes) -> int:
    """Largest batch tile whose double-buffered footprint fits under the limit."""
    if B <= 8:
        return B                                   # block row dim == full dim
    reserved = 2 * w_bytes + (4 << 20)             # double-buffered w/b + headroom
    x_budget = max(vmem_limit - reserved, 2 << 20)
    per_row = 2 * F * x_itemsize                   # double-buffered x tile
    if 0.0 < p < 1.0:
        per_row += 3 * F * 4 + F * x_itemsize      # int32 hash temps + masked copy
    per_row += 2 * out_cols * out_itemsize + out_cols * 4   # out bufs + f32 acc
    tile = max(8, (x_budget // per_row) // 8 * 8)
    tile = min(tile, _round_up(B, 8))
    # Keep >= 2 grid steps so the "parallel" batch axis can feed both v7x cores.
    tile = min(tile, max(8, _round_up((B + 1) // 2, 8)))
    return tile


def dropout_fc(x, w, b, seed, p: float = 0.0, *, bf16_matmul: bool = False):
    """x: [B, F], w: [F, 4] (torch weight transposed), b: [4] -> [B, 4]."""
    B, F = x.shape
    N = w.shape[1]
    assert w.shape == (F, N) and b.shape == (N,)
    assert p >= 0.0
    if p >= 1.0:
        # nn.Dropout(p=1) zeroes every element -> the linear output is just bias.
        return jnp.broadcast_to(b.astype(x.dtype), (B, N))

    # Small F: store only the real N columns (no write amplification, no
    # post-slice).  Large F: lane-dense 128-wide padded store, sliced after.
    lane_dense = F >= LANE_DENSE_MIN_F
    n_cols = _round_up(N, LANE) if lane_dense else N
    if lane_dense:
        w_k = jnp.zeros((F, n_cols), w.dtype).at[:, :N].set(w)
        b_k = jnp.zeros((1, n_cols), jnp.float32).at[0, :N].set(b.astype(jnp.float32))
    else:
        w_k = w
        b_k = b.astype(jnp.float32).reshape(1, N)

    x_itemsize = jnp.dtype(x.dtype).itemsize
    vmem_limit = _vmem_limit_bytes()
    w_bytes = F * n_cols * jnp.dtype(w_k.dtype).itemsize + n_cols * 4
    tile = _pick_tile_rows(B, F, x_itemsize, n_cols, x_itemsize, p,
                           vmem_limit, w_bytes)
    grid = (pl.cdiv(B, tile),)   # ragged last block is masked by Pallas (no jnp.pad)

    kernel = functools.partial(dropout_fc_kernel, p=float(p),
                               bf16_matmul=bf16_matmul)

    out = pl.pallas_call(
        kernel,
        out_shape=jax.ShapeDtypeStruct((B, n_cols), x.dtype),
        grid_spec=pltpu.PrefetchScalarGridSpec(
            num_scalar_prefetch=1,                 # seed -> SMEM
            grid=grid,
            in_specs=[
                pl.BlockSpec((tile, F), lambda i, seed: (i, 0)),     # x tile
                pl.BlockSpec((F, n_cols), lambda i, seed: (0, 0)),   # w resident
                pl.BlockSpec((1, n_cols), lambda i, seed: (0, 0)),   # b resident
            ],
            out_specs=pl.BlockSpec((tile, n_cols), lambda i, seed: (i, 0)),
        ),
        compiler_params=pltpu.CompilerParams(
            dimension_semantics=("parallel",),     # megacore batch split on v7x
            vmem_limit_bytes=vmem_limit),
    )(seed, x, w_k, b_k)

    return out[:, :N] if lane_dense else out


if __name__ == "__main__":
    in_features = 32
    out_features = OUT_FEATURES    # fixed by the module: nn.Linear(in_features, 4)
    batch = 8

    key = jax.random.PRNGKey(0)
    kx, kw, kb = jax.random.split(key, 3)

    x = jax.random.normal(kx, (batch, in_features), dtype=jnp.float32)
    # Deterministic "Linear" params (PyTorch shape: weight [4, in_features]).
    w_torch_layout = jax.random.normal(kw, (out_features, in_features),
                                       dtype=jnp.float32) * 0.1
    b = jax.random.normal(kb, (out_features,), dtype=jnp.float32) * 0.1

    w = w_torch_layout.T                 # [in_features, 4] for x @ w
    seed = jnp.array([0], dtype=jnp.int32)

    # p = 0 (module default): dropout is the identity -> matches x @ W^T + b.
    out = jax.block_until_ready(dropout_fc(x, w, b, seed, p=0.0))
    ref = x @ w + b[None, :]
    assert out.shape == (batch, out_features)
    assert jnp.allclose(out, ref, atol=1e-5, rtol=1e-5)

    # Exercise the p > 0 path as well.
    # TODO(synk): dropout mask uses an in-kernel stateless hash PRNG; it cannot
    # bit-match torch.nn.Dropout's RNG stream.
    out_drop = jax.block_until_ready(dropout_fc(x, w, b, seed, p=0.5))
    assert out_drop.shape == (batch, out_features)
    assert bool(jnp.all(jnp.isfinite(out_drop)))

    # p >= 1 guard: output is just the bias.
    out_p1 = jax.block_until_ready(dropout_fc(x, w, b, seed, p=1.0))
    assert jnp.allclose(out_p1, jnp.broadcast_to(b, (batch, out_features)))

    print("KERNEL_OK")
</pallas_src>

<mosaic_0001>
module attributes {stable_mosaic.version = 11 : i64} {
  func.func @dropout_fc_kernel(%arg0: i32, %arg1: memref<1xi32, #tpu.memory_space<smem>>, %arg2: memref<8x32xf32, #tpu.memory_space<vmem>>, %arg3: memref<32x4xf32, #tpu.memory_space<vmem>>, %arg4: memref<1x4xf32, #tpu.memory_space<vmem>>, %arg5: memref<8x4xf32, #tpu.memory_space<vmem>>) attributes {dimension_semantics = [#tpu.dimension_semantics<parallel>], iteration_bounds = array<i64: 1>, scalar_prefetch = 1 : i64, scratch_operands = 0 : i64, tpu.core_type = #tpu.core_type<tc>, window_params = [{transform_indices = @transform_0, window_bounds = array<i64: 8, 32>}, {pipeline_mode = #tpu.pipeline_mode<synchronous>, transform_indices = @transform_1, window_bounds = array<i64: 32, 4>}, {pipeline_mode = #tpu.pipeline_mode<synchronous>, transform_indices = @transform_2, window_bounds = array<i64: 1, 4>}, {transform_indices = @transform_3, window_bounds = array<i64: 8, 4>}]} {
    %c0 = arith.constant 0 : index
    %c0_0 = arith.constant 0 : index
    %0 = vector.load %arg2[%c0, %c0_0] : memref<8x32xf32, #tpu.memory_space<vmem>>, vector<8x32xf32>
    %c0_1 = arith.constant 0 : index
    %c0_2 = arith.constant 0 : index
    %1 = vector.load %arg3[%c0_1, %c0_2] : memref<32x4xf32, #tpu.memory_space<vmem>>, vector<32x4xf32>
    %cst = arith.constant dense<0.000000e+00> : vector<8x4xf32>
    %2 = tpu.matmul %0, %1, %cst {dimension_numbers = #tpu.dot_dimension_numbers<[1], [0], [0], [1], [0, 0, 1, 1], [], []>} : vector<8x32xf32>, vector<32x4xf32>, vector<8x4xf32> -> vector<8x4xf32>
    %c0_3 = arith.constant 0 : index
    %c0_4 = arith.constant 0 : index
    %3 = vector.load %arg4[%c0_3, %c0_4] : memref<1x4xf32, #tpu.memory_space<vmem>>, vector<1x4xf32>
    %4 = vector.broadcast %3 : vector<1x4xf32> to vector<8x4xf32>
    %5 = arith.addf %2, %4 : vector<8x4xf32>
    %c0_5 = arith.constant 0 : index
    %c0_6 = arith.constant 0 : index
    %6 = vector.load %arg5[%c0_5, %c0_6] : memref<8x4xf32, #tpu.memory_space<vmem>>, vector<8x4xf32>
    tpu.vector_store %arg5[%c0_5, %c0_6], %5 {strides = array<i32>} : memref<8x4xf32, #tpu.memory_space<vmem>>, vector<8x4xf32>,
    return
  }
  func.func @transform_0(%arg0: i32, %arg1: memref<1xi32, #tpu.memory_space<smem>>) -> (i32, i32) {
    %c0_i32 = arith.constant 0 : i32
    %c0_i32_0 = arith.constant 0 : i32
    return %arg0, %c0_i32 : i32, i32
  }
  func.func @transform_1(%arg0: i32, %arg1: memref<1xi32, #tpu.memory_space<smem>>) -> (i32, i32) {
    %c0_i32 = arith.constant 0 : i32
    %c0_i32_0 = arith.constant 0 : i32
    %c0_i32_1 = arith.constant 0 : i32
    return %c0_i32, %c0_i32_0 : i32, i32
  }
  func.func @transform_2(%arg0: i32, %arg1: memref<1xi32, #tpu.memory_space<smem>>) -> (i32, i32) {
    %c0_i32 = arith.constant 0 : i32
    %c0_i32_0 = arith.constant 0 : i32
    %c0_i32_1 = arith.constant 0 : i32
    return %c0_i32, %c0_i32_0 : i32, i32
  }
  func.func @transform_3(%arg0: i32, %arg1: memref<1xi32, #tpu.memory_space<smem>>) -> (i32, i32) {
    %c0_i32 = arith.constant 0 : i32
    %c0_i32_0 = arith.constant 0 : i32
    return %arg0, %c0_i32 : i32, i32
  }
}

</mosaic_0001>

<bundles_post_ra>
// kernel: tpu_custom_call.1
= control target key start
LH: loop header
LB: loop body
LE: loop exit
PB: predicated region body
PF: predicated region fallthrough
CT: control target
= control target key end

     0   :  { %v128_v0 = vmov 0.0   ;;  %vm129_vm0 = vmmov 0   ;;  %vm28_vm1 = vcmask 261120   ;;  %vm102_vm2 = vcmask 31744   ;;  %s176_s0 = inlined_call_operand.<no memory space> [shape: s32[1], index: 0, kind: input, shape index: {}]   ;;  %s177_s2 = inlined_call_operand.vmem [shape: f32[32,4], index: 2, kind: input, shape index: {}]   ;;  %s178_s1 = inlined_call_operand.vmem [shape: f32[8,32], index: 1, kind: input, shape index: {}]   ;;  %s179_s3 = inlined_call_operand.vmem [shape: f32[1,4], index: 3, kind: input, shape index: {}]   ;;  %s180_s4 = inlined_call_operand.vmem [shape: f32[8,4], index: 4, kind: output, shape index: {}]  }
   0x1   :  { %115 = vmatprep.subr.mxu0 %v128_v0  ;;  %v20_v1 = vld [vmem:[%s177_s2 + $0x18] sm:$0xff]  ;;  %v19_v2 = vld [vmem:[%s177_s2 + $0x10] sm:$0xff]  ;;  %123 = vmatprep.mubr.msk.f32.mxu0 %vm129_vm0, %v128_v0  ;;  %v18_v3 = vld [vmem:[%s177_s2 + $0x8] sm:$0xff] }
   0x2   :  { %116 = vmatpush3.msra.mxu0 %v20_v1  ;;  %v17_v4 = vld [vmem:[%s177_s2] sm:$0xff] }
   0x3   :  { %117 = vmatprep.subr.mxu0 %v128_v0  ;;  %v16_v5 = vld [vmem:[%s178_s1] sm:$0xff] }
   0x4   :  { %118 = vmatpush3.msra.mxu0 %v19_v2  ;;  %v108_v6 = vld [vmem:[%s179_s3] ss:$0 sm:$0xff] }
   0x5   :  { %119 = vmatprep.subr.mxu0 %v128_v0 }
   0x6   :  { %120 = vmatpush3.msra.mxu0 %v18_v3 }
   0x7   :  { %121 = vmatprep.subr.mxu0 %v128_v0 }
   0x8   :  { %122 = vmatpush3.msra.mxu0 %v17_v4 }
   0x9   :  { %124 = vmatmul.mubr.msk.f32.vlgmr.msra.gmra.mxu0 %vm28_vm1, %v16_v5 }
  0xc9   :  { %v98_v7 = vpop.f32.mrf.mxu0 }
  0xca   :  { %v99_v8 = vadd.f32 %v108_v6, %v98_v7 }
  0xcb   :  { %v125_v9 = vpop.f32.mrf.mxu0 }
  0xcc   :  { %103 = vst.msk [vmem:[%s180_s4] sm:$0xff] %vm102_vm2, %v99_v8 }

</bundles_post_ra>
